<compile_context>
chip_gen: v7x
topology: tpu7x:2x2x1
jax: 0.10.0
libtpu: 0.0.40
codegen_flags: <defaults>
</compile_context>

<pallas_src>
import functools
import math

import numpy as np

import jax
import jax.numpy as jnp
from jax import lax
from jax.experimental import pallas as pl
from jax.experimental.pallas import tpu as pltpu


def _fmix32(h):
    """murmur3 finalizer on uint32 (wrap-around arithmetic)."""
    h = h ^ (h >> jnp.uint32(16))
    h = h * jnp.uint32(0x85EBCA6B)
    h = h ^ (h >> jnp.uint32(13))
    h = h * jnp.uint32(0xC2B2AE35)
    h = h ^ (h >> jnp.uint32(16))
    return h


def _pos_encoder_kernel(seed_ref, embs_ref, pe_ref, out_ref, *, p_drop,
                        training, tile_s):
    # embs_ref / pe_ref / out_ref: (tile_s, D) blocks (batch dim squeezed).
    x = embs_ref[...] + pe_ref[...]

    if training and p_drop > 0.0:
        rows, cols = out_ref.shape
        # Per-(seed, batch) base value, then per-element counter hash.
        seed = seed_ref[0].astype(jnp.uint32)
        b = pl.program_id(0).astype(jnp.uint32)
        s_blk = pl.program_id(1).astype(jnp.uint32)
        base = _fmix32(seed ^ ((b + jnp.uint32(1)) * jnp.uint32(0x9E3779B1)))

        row = lax.broadcasted_iota(jnp.uint32, (rows, cols), 0)
        col = lax.broadcasted_iota(jnp.uint32, (rows, cols), 1)
        idx = (s_blk * jnp.uint32(tile_s) + row) * jnp.uint32(cols) + col
        h = _fmix32(idx ^ base)

        # Uniform integer in [0, 2^24); keep iff >= p * 2^24.
        r = h & jnp.uint32((1 << 24) - 1)
        thr = jnp.uint32(int(round(p_drop * (1 << 24))))
        keep = r >= thr

        scale = jnp.float32(1.0 / (1.0 - p_drop))
        xf = x.astype(jnp.float32)
        x = jnp.where(keep, xf * scale, jnp.zeros_like(xf))

    out_ref[...] = x.astype(out_ref.dtype)


def _choose_seq_tile(S, D, itemsize):
    """Largest seq tile that (a) keeps a block around <=2 MiB, (b) leaves a
    handful of seq blocks when S is large (megacore sharding), and
    (c) obeys the sublane-multiple constraint for partial blocks."""
    rows_by_bytes = max(8, (2 * 1024 * 1024) // max(1, D * itemsize))
    rows_by_grid = max(512, pl.cdiv(S, 8))   # >=8 seq blocks, never <512 rows
    tile = min(rows_by_bytes, rows_by_grid)
    if tile >= S:
        return S                              # full axis: always legal
    m = 16 if itemsize < 4 else 8             # sublane multiple
    tile = max(m, (tile // m) * m)
    return min(tile, S)


def pos_encoder(embs, pe, *, p_drop=0.1, training=False, seed=0):
    """embs: (B, S, D); pe: (B_param, max_seq_len, D), B<=B_param, S<=max_seq_len."""
    B, S, D = embs.shape
    B_param, S_max, D_pe = pe.shape
    assert D_pe == D and B <= B_param and S <= S_max

    itemsize = jnp.dtype(embs.dtype).itemsize
    tile_s = _choose_seq_tile(S, D, itemsize)
    grid = (B, pl.cdiv(S, tile_s))

    seed_arr = jnp.asarray([seed], dtype=jnp.int32)
    kernel = functools.partial(_pos_encoder_kernel, p_drop=float(p_drop),
                               training=bool(training), tile_s=int(tile_s))

    block = (None, tile_s, D)   # batch dim squeezed inside the kernel
    return pl.pallas_call(
        kernel,
        out_shape=jax.ShapeDtypeStruct((B, S, D), embs.dtype),
        grid_spec=pltpu.PrefetchScalarGridSpec(
            num_scalar_prefetch=1,            # dropout seed (SMEM scalar)
            grid=grid,
            in_specs=[
                pl.BlockSpec(block, lambda b, s, seed_ref: (b, s, 0)),  # embs
                pl.BlockSpec(block, lambda b, s, seed_ref: (b, s, 0)),  # PE
            ],
            out_specs=pl.BlockSpec(block, lambda b, s, seed_ref: (b, s, 0)),
        ),
        compiler_params=pltpu.CompilerParams(
            dimension_semantics=("parallel", "parallel"),
            vmem_limit_bytes=32 * 1024 * 1024,
        ),
    )(seed_arr, embs, pe)


if __name__ == "__main__":
    # Module hyper-params (small, consistent with PosEncoder(bsz, max_seq_len, d_emb)).
    bsz, max_seq_len, d_emb = 2, 12, 32
    batch, seq = 2, 8            # forward input: embs of shape (batch, seq, d_emb)
    p_drop = 0.1

    key = jax.random.PRNGKey(0)
    embs = jax.random.normal(key, (batch, seq, d_emb), dtype=jnp.float32)

    # Positional-encoding table exactly as the module's __init__ builds it,
    # then repeated over the batch dim (PE.repeat(bsz, 1, 1)).
    pe = np.zeros((max_seq_len, d_emb), dtype=np.float32)
    for pos in range(max_seq_len):
        for i in range(d_emb // 2):
            pe[pos, 2 * i] = math.sin(pos / 10000 ** (2 * i / d_emb))
            pe[pos, 2 * i + 1] = math.cos(pos / 10000 ** (2 * i / d_emb))
    pe_full = jnp.asarray(np.tile(pe[None], (bsz, 1, 1)))

    # Eval mode: dropout is the identity -> exact check vs. reference.
    out = pos_encoder(embs, pe_full, p_drop=p_drop, training=False)
    out = jax.block_until_ready(out)
    ref = embs + pe_full[:batch, :seq, :]
    assert out.shape == ref.shape and out.dtype == ref.dtype
    assert jnp.allclose(out, ref, atol=1e-6, rtol=1e-6), "eval-mode mismatch"

    # Training mode: every element must be either dropped (0) or scaled by 1/(1-p).
    # TODO(synk): bit-exact parity with torch's dropout RNG stream is not possible;
    # semantics (Bernoulli keep-prob 1-p, inverted scaling) are preserved.
    out_tr = pos_encoder(embs, pe_full, p_drop=p_drop, training=True, seed=1234)
    out_tr = jax.block_until_ready(out_tr)
    scaled = ref / (1.0 - p_drop)
    is_zero = jnp.isclose(out_tr, 0.0, atol=1e-6)
    is_scaled = jnp.isclose(out_tr, scaled, atol=1e-5, rtol=1e-5)
    assert bool(jnp.all(is_zero | is_scaled)), "training-mode dropout mismatch"
    frac_dropped = float(jnp.mean((is_zero & ~is_scaled).astype(jnp.float32)))
    assert frac_dropped <= 0.5, f"implausible dropout rate {frac_dropped}"

    print("KERNEL_OK")
</pallas_src>

<mosaic_0001>
module attributes {stable_mosaic.version = 11 : i64} {
  func.func @_pos_encoder_kernel(%arg0: i32, %arg1: i32, %arg2: memref<1xi32, #tpu.memory_space<smem>>, %arg3: memref<1x8x32xf32, #tpu.memory_space<vmem>>, %arg4: memref<1x8x32xf32, #tpu.memory_space<vmem>>, %arg5: memref<1x8x32xf32, #tpu.memory_space<vmem>>) attributes {dimension_semantics = [#tpu.dimension_semantics<parallel>, #tpu.dimension_semantics<parallel>], iteration_bounds = array<i64: 2, 1>, scalar_prefetch = 1 : i64, scratch_operands = 0 : i64, tpu.core_type = #tpu.core_type<tc>, window_params = [{transform_indices = @transform_0, window_bounds = array<i64: 1, 8, 32>}, {transform_indices = @transform_1, window_bounds = array<i64: 1, 8, 32>}, {transform_indices = @transform_2, window_bounds = array<i64: 1, 8, 32>}]} {
    %c0 = arith.constant 0 : index
    %c0_0 = arith.constant 0 : index
    %c0_1 = arith.constant 0 : index
    %0 = vector.load %arg3[%c0, %c0_0, %c0_1] : memref<1x8x32xf32, #tpu.memory_space<vmem>>, vector<1x8x32xf32>
    %1 = vector.shape_cast %0 : vector<1x8x32xf32> to vector<8x32xf32>
    %c0_2 = arith.constant 0 : index
    %c0_3 = arith.constant 0 : index
    %c0_4 = arith.constant 0 : index
    %2 = vector.load %arg4[%c0_2, %c0_3, %c0_4] : memref<1x8x32xf32, #tpu.memory_space<vmem>>, vector<1x8x32xf32>
    %3 = vector.shape_cast %2 : vector<1x8x32xf32> to vector<8x32xf32>
    %4 = arith.addf %1, %3 : vector<8x32xf32>
    %c0_5 = arith.constant 0 : index
    %c0_6 = arith.constant 0 : index
    %c0_7 = arith.constant 0 : index
    %5 = vector.load %arg5[%c0_5, %c0_6, %c0_7] : memref<1x8x32xf32, #tpu.memory_space<vmem>>, vector<1x8x32xf32>
    %6 = vector.shape_cast %5 : vector<1x8x32xf32> to vector<8x32xf32>
    %7 = vector.shape_cast %4 : vector<8x32xf32> to vector<1x8x32xf32>
    tpu.vector_store %arg5[%c0_5, %c0_6, %c0_7], %7 {strides = array<i32>} : memref<1x8x32xf32, #tpu.memory_space<vmem>>, vector<1x8x32xf32>,
    return
  }
  func.func @transform_0(%arg0: i32, %arg1: i32, %arg2: memref<1xi32, #tpu.memory_space<smem>>) -> (i32, i32, i32) {
    %c0_i32 = arith.constant 0 : i32
    %c0_i32_0 = arith.constant 0 : i32
    return %arg0, %arg1, %c0_i32 : i32, i32, i32
  }
  func.func @transform_1(%arg0: i32, %arg1: i32, %arg2: memref<1xi32, #tpu.memory_space<smem>>) -> (i32, i32, i32) {
    %c0_i32 = arith.constant 0 : i32
    %c0_i32_0 = arith.constant 0 : i32
    return %arg0, %arg1, %c0_i32 : i32, i32, i32
  }
  func.func @transform_2(%arg0: i32, %arg1: i32, %arg2: memref<1xi32, #tpu.memory_space<smem>>) -> (i32, i32, i32) {
    %c0_i32 = arith.constant 0 : i32
    %c0_i32_0 = arith.constant 0 : i32
    return %arg0, %arg1, %c0_i32 : i32, i32, i32
  }
}

</mosaic_0001>

<bundles_post_ra>
// kernel: tpu_custom_call.1
= control target key start
LH: loop header
LB: loop body
LE: loop exit
PB: predicated region body
PF: predicated region fallthrough
CT: control target
= control target key end

     0   :  { %9 = vsyncpa [#allocation5], 0  ;;  %s591_s0 = inlined_call_operand.<no memory space> [shape: s32[1], index: 0, kind: input, shape index: {}]   ;;  %s592_s1 = inlined_call_operand.vmem [shape: f32[2,8,32], index: 1, kind: input, shape index: {}]   ;;  %s593_s2 = inlined_call_operand.vmem [shape: f32[2,12,32], index: 2, kind: input, shape index: {}]   ;;  %s594_s3 = inlined_call_operand.hbm [shape: f32[2,8,32], index: 3, kind: output, shape index: {}]  }
   0x1   :  { %11 = vsyncpa [#allocation5 + $0x1], 0  ;;  %s476_s12 = smov 0   ;;  %s478_s13 = smov 0  }
   0x2   :  { %s480_s14 = smov 0   ;;  %s482_s15 = smov 0  }
   0x3   :  { %s484_s0 = smov 0   ;;  %s486_s16 = smov 0  }
   0x4 LB: > { %s306_s17 = sadd.s32 4294967295, %s453_s16   ;;  %s307_s18 = sadd.s32 4294967294, %s453_s16   ;;  %s453_s16 = sphi %s486_s16, %s17_s16   ;;  %s449_s0 = sphi %s484_s0, %s601_s0   ;;  %s445_s15 = sphi %s482_s15, %s600_s15   ;;  %s441_s14 = sphi %s480_s14, %s599_s14   ;;  %s437_s13 = sphi %s478_s13, %s598_s13   ;;  %s433_s12 = sphi %s476_s12, %s597_s12  }
   0x5   : > { %s29_s19 = sadd.s32 1, %s449_s0  ;;  %s94_s20 = sadd.s32 1, %s441_s14 }
   0x6   : > { %p31_p0 = scmp.ge.s32.totalorder %s29_s19, 2  ;;  %p104_p1 = scmp.ne.s32.totalorder %s441_s14, %s437_s13 }
   0x7   : > { %p105_p2 = scmp.eq.s32.totalorder %s306_s17, 1  ;;  %p110_p3 = scmp.ne.s32.totalorder %s437_s13, %s433_s12 }
   0x8   : > { %s603_s19 = smov (%p31_p0, %s29_s19), 0  ;;  %p111_p5 = scmp.eq.s32.totalorder %s307_s18, 1 }
   0x9   : > { %p516_p4 = por %p105_p2, %p104_p1  ;;  %s89_s22 = ssub.s32 %s449_s0, %s603_s19 }
   0xa   : > { %p310_p6 = scmp.ge.s32.totalorder %s453_s16, 1  ;;  %p92_p7 = scmp.eq.s32.totalorder %s89_s22, 0 }
   0xb   : > { %p523_p8 = por %p111_p5, %p110_p3  ;;  %p150_p9 = scmp.lt.s32.totalorder %s453_s16, 3 }
   0xc   : > { %s529_s24 = scalar_select %p92_p7, %s441_s14, %s94_s20  }
   0xd   : > { %p151_p10 = pnand %p310_p6, %p150_p9 }
   0xe   : > { %s179_s25 = sand.u32 (!%p151_p10), 1, %s437_s13   ;;  %p182_p11 = scmp.lt.s32.totalorder (!%p151_p10), %s445_s15, 1  ;;  %vm200_vm0 = vcmask (!%p151_p10), 261120  }
   0xf   : > { %154 = sbr.rel (%p151_p10) target bundleno = 47 (0x2f), region = 28  ;;  %s311_s26 = sshll.u32 (!%p151_p10), %s179_s25, 3 }
  0x10   : > { %s181_s28 = scalar_lea.vmem (!%p151_p10), [#allocation4], %s311_s26  ;;  %s316_s30 = sshll.u32 (!%p151_p10), %s445_s15, 7 }
  0x11   : > { %s217_s29 = sshll.u32 (!%p151_p10), %s181_s28, 4  ;;  %s203_s20 = scalar_lea.sflag (!%p151_p10), [#allocation5], %s179_s25  ;;  %s541_s29 = int_to_ptr.vmem [resolvable:$true] %s217_s29 }
  0x12   : > { %s375_s22 = scalar_lea.vmem (!%p151_p10), %s541_s29, 128  ;;  %s455_s26 = smov (!%p151_p10), [#allocation4]  }
  0x13   : > { %p376_p12 = scmp.ne.s32.totalorder (!%p151_p10), %s541_s29, %s375_s22 }
  0x15   : > { %p377_p13 = pnand (!%p151_p10), %p376_p12, %p516_p4 }
  0x16   : > { %s183_s27 = scalar_select %p182_p11, %s445_s15, 1 }
  0x17   : > { %s546_s15 = scalar_lea.hbm %s594_s3, %s316_s30  ;;  %p378_p0 = pneg %p377_p13 }
  0x18   : > { %s312_s4 = sshll.u32 %s183_s27, 3  ;;  %s319_s5 = sshll.u32 %s183_s27, 4 }
  0x19   : > { %s188_s8 = scalar_lea.vmem %s592_s1, %s312_s4  ;;  %s196_s11 = scalar_lea.vmem %s593_s2, %s319_s5 }
  0x1a   : > { %v197_v0 = vld [vmem:[%s188_s8] sm:$0xff]  ;;  %s379_s27 = sshll.u32 %s455_s26, 4  ;;  %s380_s27 = int_to_ptr.vmem [resolvable:$false] %s379_s27 }
  0x1b   : > { %v198_v1 = vld [vmem:[%s196_s11] sm:$0xff]  ;;  %s381_s4 = scalar_lea.vmem %s380_s27, 256  ;;  %p382_p1 = scmp.lt.s32.totalorder %s541_s29, %s380_s27 }
  0x1c   : > { %v199_v2 = vadd.f32 %v198_v1, %v197_v0  ;;  %p383_p2 = scmp.lt.s32.totalorder %s381_s4, %s375_s22 }
  0x1e   : > { %201 = vst.msk [vmem:[%s181_s28] sm:$0xff] %vm200_vm0, %v199_v2  ;;  %p384_p3 = por %p383_p2, %p382_p1 }
  0x20   : > { %p385_p5 = pnand %p384_p3, %p378_p0 }
  0x22   : > { %388 = shalt.err (!%p385_p5)
}
  0x23   : > { %s389_s25 = scalar_lea.hbm %s546_s15, 128  ;;  %s393_s5 = scalar_lea.hbm %s594_s3, 256 }
  0x24   : > { %p390_p6 = scmp.ne.s32.totalorder %s546_s15, %s389_s25  ;;  %p394_p10 = scmp.lt.u32.totalorder %s546_s15, %s594_s3 }
  0x25   : > { %p395_p11 = scmp.lt.u32.totalorder %s393_s5, %s389_s25  ;;  %p397_p13 = scmp.lt.u32.totalorder %s389_s25, %s546_s15 }
  0x26   : > { %p391_p7 = pnand %p390_p6, %p516_p4 }
  0x27   : > { %p396_p12 = por %p395_p11, %p394_p10 }
  0x28   : > { %p392_p9 = pneg %p391_p7 }
  0x29   : > { %p398_p0 = por %p397_p13, %p396_p12 }
  0x2b   : > { %p399_p1 = pnand %p398_p0, %p392_p9 }
  0x2d   : > { %402 = shalt.err (!%p399_p1)
}
  0x2e   : > { %320 = dma.vmem_to_hbm [thread:$0]  (%p516_p4), %s541_s29, 128, %s546_s15, %s203_s20  }
  0x2f PF: > { %p326_p2 = scmp.ge.s32.totalorder %s453_s16, 2  ;;  %s229_s8 = sand.u32 1, %s433_s12  }
  0x30   : > { %s230_s9 = scalar_lea.sflag [#allocation5], %s229_s8 }
  0x31   : > { %p323_p3 = pnand %p326_p2, %p523_p8 }
  0x33   : > { %428 = dma.done.wait (!%p323_p3), %s230_s9, 128  }
  0x34   : > { %430 = vsyncadd (!%p323_p3), %s230_s9, 4294967168  ;;  %s17_s16 = sadd.s32 1, %s453_s16   ;;  %s597_s12 = smov %s437_s13 }
  0x35   : > { %p14_p5 = scmp.ge.s32.totalorder %s17_s16, 4   ;;  %s598_s13 = smov %s441_s14 }
  0x36   : > { %s599_s14 = smov %s529_s24  ;;  %s600_s15 = smov %s449_s0 }
  0x37   : > { %s601_s0 = smov %s603_s19  ;;  %16 = sbr.rel (!%p14_p5) target bundleno = 4 (0x4), region = 66 }
  0x3e   :  { %235 = vsyncpa [#allocation5], 1 }
  0x3f   :  { %237 = vsyncpa [#allocation5 + $0x1], 1 }

</bundles_post_ra>
